<compile_context>
chip_gen: v6e
topology: v6e:2x2x1
jax: 0.10.0
libtpu: 0.0.40
codegen_flags: <defaults>
</compile_context>

<pallas_src>
import jax
import jax.numpy as jnp
from jax.experimental import pallas as pl
from jax.experimental.pallas import tpu as pltpu

BN_EPS = 1e-5


def _round_up(x, m):
    return (x + m - 1) // m * m


def _cdiv(a, b):
    return -(-a // b)


def _vmem_budget_bytes():
    """Scoped-VMEM budget: 75% of physical per-core VMEM, leaving headroom for compiler
    scratch / semaphores / IO double buffers.  Falls back to the v7x 64 MiB."""
    phys = 64 * 1024 * 1024
    try:
        info = pltpu.get_tpu_info()
        phys = int(getattr(info, "vmem_capacity_bytes", phys) or phys)
    except Exception:
        pass
    return (phys * 3) // 4


_VMEM_BUDGET = _vmem_budget_bytes()


def _pick_tiling(M, K, Cs, out_bytes, vmem_budget):
    """Return (tm, nc, npc): rows-per-tile (lane axis), TensorCore split, tiles/core."""
    tm = 4096
    while tm > 256:
        # double-buffered patches + bf16/out blocks + f32 matmul result + weights
        ws = 2 * tm * (2 * K + (2 + out_bytes) * Cs) + 4 * tm * Cs + 8 * Cs * K
        if ws <= vmem_budget // 2:
            break
        tm //= 2
    nc = 2 if M >= 2 * tm else 1            # core-split only when there is enough work
    rows_per_core = _cdiv(M, nc)
    tm = min(tm, _round_up(rows_per_core, 128))   # keep the lane axis a multiple of 128
    npc = _cdiv(rows_per_core, tm)
    return tm, nc, npc


# ---------------- Pass 1: conv matmul + per-channel sum / sum-of-squares ----------------
# Layout: p_ref (K, tm) bf16, w_ref (Cs, K) bf16  ->  y = W @ P  is (Cs, tm) f32
# (channels on sublanes, output rows on lanes => all stores are lane-dense).

def _accumulate_stats(y, sum_ref, ssq_ref):
    @pl.when(pl.program_id(1) == 0)
    def _init():
        sum_ref[...] = jnp.zeros_like(sum_ref)
        ssq_ref[...] = jnp.zeros_like(ssq_ref)

    sum_ref[...] += jnp.sum(y, axis=1, keepdims=True)[None]       # (1, Cs, 1)
    ssq_ref[...] += jnp.sum(y * y, axis=1, keepdims=True)[None]


def conv_store_stats_kernel(p_ref, w_ref, y_ref, sum_ref, ssq_ref):
    """Store variant: write the pre-BN activation in bf16 and accumulate f32 stats."""
    y = jnp.dot(w_ref[...], p_ref[...], preferred_element_type=jnp.float32)
    y_ref[...] = y.astype(y_ref.dtype)
    _accumulate_stats(y, sum_ref, ssq_ref)


def conv_stats_only_kernel(p_ref, w_ref, sum_ref, ssq_ref):
    """Recompute variant: statistics only; the matmul is redone (fused) in pass 2."""
    y = jnp.dot(w_ref[...], p_ref[...], preferred_element_type=jnp.float32)
    _accumulate_stats(y, sum_ref, ssq_ref)


# ---------------- Pass 2: folded BN affine (one FMA) + ReLU ----------------

def bn_relu_kernel(y_ref, scale_ref, shift_ref, o_ref):
    y = y_ref[...].astype(jnp.float32)                            # (Cs, tm)
    o_ref[...] = jnp.maximum(y * scale_ref[...] + shift_ref[...], 0.0).astype(o_ref.dtype)


def conv_bn_relu_kernel(p_ref, w_ref, scale_ref, shift_ref, o_ref):
    y = jnp.dot(w_ref[...], p_ref[...], preferred_element_type=jnp.float32)
    o_ref[...] = jnp.maximum(y * scale_ref[...] + shift_ref[...], 0.0).astype(o_ref.dtype)


@jax.jit
def conv3x3_forward(x, weight, bias, gamma, beta):
    """x: (N, Cin, H, W) NCHW. weight: (Cout, Cin, 3, 3). Returns (N, Cout, Ho, Wo)."""
    N, Cin, H, W = x.shape
    Cout = weight.shape[0]
    stride = 2
    Ho = (H + 2 - 3) // stride + 1
    Wo = (W + 2 - 3) // stride + 1
    K = Cin * 9
    M = N * Ho * Wo

    Cs = _round_up(Cout, 8)               # sublane padding only (channels on sublanes)
    out_dtype = x.dtype
    ob = jnp.dtype(out_dtype).itemsize
    vmem_limit = _VMEM_BUDGET
    tm, nc, npc = _pick_tiling(M, K, Cs, ob, vmem_limit)
    n_tiles = nc * npc
    Mp = n_tiles * tm

    # Static per-shape heuristic: re-read one patch column (2K bytes) vs the bf16
    # intermediate's write+read round trip (4*Cs bytes).  MXU flops are free here.
    recompute = (2 * K) < (4 * Cs)

    # --- glue: pad + transposed im2col -> (K, Mp), rows on the lane axis.
    # allow_input_fusion lets XLA fuse this producer into the pallas operand. ---
    xp = jnp.pad(x, ((0, 0), (0, 0), (1, 1), (1, 1)))
    cols = [xp[:, :, kh:kh + stride * Ho:stride, kw:kw + stride * Wo:stride]
            for kh in range(3) for kw in range(3)]
    pt = jnp.stack(cols, axis=2)                                   # (N, Cin, 9, Ho, Wo)
    pt = jnp.transpose(pt, (1, 2, 0, 3, 4)).reshape(K, M)          # (Cin*9, N*Ho*Wo)
    patches = jnp.pad(pt, ((0, 0), (0, Mp - M))).astype(jnp.bfloat16)

    # Conv weight as (Cs, K) with matching (cin, kh, kw) flattening; Cout padded to Cs.
    w2d = jnp.pad(weight.reshape(Cout, K), ((0, Cs - Cout), (0, 0))).astype(jnp.bfloat16)

    # Conv bias intentionally unused: training-mode BN's mean subtraction cancels it.
    del bias

    stats_shape = jax.ShapeDtypeStruct((nc, Cs, 1), jnp.float32)
    stats_spec = pl.BlockSpec((1, Cs, 1), lambda c, i: (c, 0, 0))  # per-core partials
    p_spec1 = pl.BlockSpec((K, tm), lambda c, i: (0, c * npc + i))
    w_spec1 = pl.BlockSpec((Cs, K), lambda c, i: (0, 0))
    pass1_params = pltpu.CompilerParams(
        dimension_semantics=("parallel", "arbitrary"),  # stats blocks revisited along i
        vmem_limit_bytes=vmem_limit,
        allow_input_fusion=[True, False])

    if recompute:
        csum_p, cssq_p = pl.pallas_call(
            conv_stats_only_kernel,
            out_shape=(stats_shape, stats_shape),
            grid=(nc, npc),
            in_specs=[p_spec1, w_spec1],
            out_specs=(stats_spec, stats_spec),
            compiler_params=pass1_params,
            cost_estimate=pl.CostEstimate(
                flops=2 * Mp * K * Cs + 3 * Mp * Cs,
                transcendentals=0,
                bytes_accessed=Mp * K * 2 + Cs * K * 2 + 2 * nc * Cs * 4),
        )(patches, w2d)
        y_bf16 = None
    else:
        y_bf16, csum_p, cssq_p = pl.pallas_call(
            conv_store_stats_kernel,
            out_shape=(jax.ShapeDtypeStruct((Cs, Mp), jnp.bfloat16),
                       stats_shape, stats_shape),
            grid=(nc, npc),
            in_specs=[p_spec1, w_spec1],
            out_specs=(pl.BlockSpec((Cs, tm), lambda c, i: (0, c * npc + i)),
                       stats_spec, stats_spec),
            compiler_params=pass1_params,
            cost_estimate=pl.CostEstimate(
                flops=2 * Mp * K * Cs + 3 * Mp * Cs,
                transcendentals=0,
                bytes_accessed=Mp * K * 2 + Cs * K * 2 + Mp * Cs * 2 + 2 * nc * Cs * 4),
        )(patches, w2d)

    # Fold BN into a single per-channel FMA.  Statistics use the REAL column count M:
    # zero-padded columns contribute exactly 0 to both sums (no conv bias).
    csum = jnp.sum(csum_p, axis=0)                        # (Cs, 1) combine core partials
    cssq = jnp.sum(cssq_p, axis=0)
    mean = csum / M
    var = jnp.maximum(cssq / M - mean * mean, 0.0)        # single-pass variance, clamped
    g = jnp.pad(gamma.astype(jnp.float32), (0, Cs - Cout)).reshape(Cs, 1)
    b = jnp.pad(beta.astype(jnp.float32), (0, Cs - Cout)).reshape(Cs, 1)
    scale = g * jax.lax.rsqrt(var + BN_EPS)
    shift = b - mean * scale

    sc_spec = pl.BlockSpec((Cs, 1), lambda i: (0, 0))     # resident per-channel params
    o_spec = pl.BlockSpec((Cs, tm), lambda i: (0, i))     # lane-dense output blocks

    if recompute:
        out2d = pl.pallas_call(
            conv_bn_relu_kernel,
            out_shape=jax.ShapeDtypeStruct((Cs, Mp), out_dtype),
            grid=(n_tiles,),
            in_specs=[pl.BlockSpec((K, tm), lambda i: (0, i)),
                      pl.BlockSpec((Cs, K), lambda i: (0, 0)),
                      sc_spec, sc_spec],
            out_specs=o_spec,
            compiler_params=pltpu.CompilerParams(
                dimension_semantics=("parallel",),
                vmem_limit_bytes=vmem_limit,
                allow_input_fusion=[True, False, False, False]),
            cost_estimate=pl.CostEstimate(
                flops=2 * Mp * K * Cs + 3 * Mp * Cs,
                transcendentals=0,
                bytes_accessed=Mp * K * 2 + Cs * K * 2 + Mp * Cs * ob + 2 * Cs * 4),
        )(patches, w2d, scale, shift)
    else:
        out2d = pl.pallas_call(
            bn_relu_kernel,
            out_shape=jax.ShapeDtypeStruct((Cs, Mp), out_dtype),
            grid=(n_tiles,),
            in_specs=[pl.BlockSpec((Cs, tm), lambda i: (0, i)), sc_spec, sc_spec],
            out_specs=o_spec,
            compiler_params=pltpu.CompilerParams(
                dimension_semantics=("parallel",),
                vmem_limit_bytes=vmem_limit),
            cost_estimate=pl.CostEstimate(
                flops=3 * Mp * Cs,
                transcendentals=0,
                bytes_accessed=Mp * Cs * 2 + Mp * Cs * ob + 2 * Cs * 4),
        )(y_bf16, scale, shift)

    # (Cs, Mp) -> slice real channels/rows -> (Cout, N, Ho, Wo) -> NCHW.
    # Leading-axis transpose keeps the contiguous Ho*Wo minor dims (cheap copy).
    out = out2d[:Cout, :M].reshape(Cout, N, Ho, Wo)
    return jnp.transpose(out, (1, 0, 2, 3))


if __name__ == "__main__":
    key = jax.random.PRNGKey(0)
    k_x, k_w, k_b, k_g, k_be = jax.random.split(key, 5)

    N, Cin, H, W = 2, 4, 16, 16
    Cout = 8

    x = jax.random.normal(k_x, (N, Cin, H, W), dtype=jnp.float32)
    # Deterministic synthetic parameters (shapes match nn.Conv2d(Cin, Cout, 3) + BatchNorm2d(Cout)).
    weight = jax.random.normal(k_w, (Cout, Cin, 3, 3), dtype=jnp.float32) * 0.1
    bias = jax.random.normal(k_b, (Cout,), dtype=jnp.float32) * 0.1
    gamma = 1.0 + 0.1 * jax.random.normal(k_g, (Cout,), dtype=jnp.float32)
    beta = 0.1 * jax.random.normal(k_be, (Cout,), dtype=jnp.float32)

    out = conv3x3_forward(x, weight, bias, gamma, beta)
    jax.block_until_ready(out)
    assert out.shape == (N, Cout, H // 2, W // 2), out.shape
    assert bool(jnp.all(jnp.isfinite(out)))

    # Loose-tolerance check against a pure-JAX f32 reference (bf16 matmul inputs and a
    # bf16 intermediate mean results are close, not bit-exact).
    ref = jax.lax.conv_general_dilated(
        x, weight, window_strides=(2, 2), padding=((1, 1), (1, 1)),
        dimension_numbers=("NCHW", "OIHW", "NCHW")) + bias[None, :, None, None]
    mu = ref.mean(axis=(0, 2, 3), keepdims=True)
    va = ref.var(axis=(0, 2, 3), keepdims=True)
    ref = jnp.maximum((ref - mu) * jax.lax.rsqrt(va + BN_EPS)
                      * gamma[None, :, None, None] + beta[None, :, None, None], 0.0)
    max_err = float(jnp.max(jnp.abs(out - ref)))
    assert max_err < 0.12, max_err

    print("KERNEL_OK")
</pallas_src>

<mosaic_0001>
module attributes {stable_mosaic.version = 11 : i64} {
  func.func @conv_store_stats_kernel(%arg0: i32, %arg1: i32, %arg2: memref<36x128xbf16, #tpu.memory_space<vmem>>, %arg3: memref<8x36xbf16, #tpu.memory_space<vmem>>, %arg4: memref<8x128xbf16, #tpu.memory_space<vmem>>, %arg5: memref<1x8x1xf32, #tpu.memory_space<vmem>>, %arg6: memref<1x8x1xf32, #tpu.memory_space<vmem>>) attributes {dimension_semantics = [#tpu.dimension_semantics<parallel>, #tpu.dimension_semantics<arbitrary>], iteration_bounds = array<i64: 1, 1>, scalar_prefetch = 0 : i64, scratch_operands = 0 : i64, tpu.core_type = #tpu.core_type<tc>, window_params = [{transform_indices = @transform_0, window_bounds = array<i64: 36, 128>}, {pipeline_mode = #tpu.pipeline_mode<synchronous>, transform_indices = @transform_1, window_bounds = array<i64: 8, 36>}, {transform_indices = @transform_2, window_bounds = array<i64: 8, 128>}, {transform_indices = @transform_3, window_bounds = array<i64: 1, 8, 1>}, {transform_indices = @transform_4, window_bounds = array<i64: 1, 8, 1>}]} {
    %c0 = arith.constant 0 : index
    %c0_0 = arith.constant 0 : index
    %0 = vector.load %arg3[%c0, %c0_0] : memref<8x36xbf16, #tpu.memory_space<vmem>>, vector<8x36xbf16>
    %c0_1 = arith.constant 0 : index
    %c0_2 = arith.constant 0 : index
    %1 = vector.load %arg2[%c0_1, %c0_2] : memref<36x128xbf16, #tpu.memory_space<vmem>>, vector<36x128xbf16>
    %cst = arith.constant dense<0.000000e+00> : vector<8x128xf32>
    %2 = tpu.matmul %0, %1, %cst {dimension_numbers = #tpu.dot_dimension_numbers<[1], [0], [0], [1], [0, 0, 1, 1], [], []>} : vector<8x36xbf16>, vector<36x128xbf16>, vector<8x128xf32> -> vector<8x128xf32>
    %3 = arith.truncf %2 : vector<8x128xf32> to vector<8x128xbf16>
    %c0_3 = arith.constant 0 : index
    %c0_4 = arith.constant 0 : index
    %4 = vector.load %arg4[%c0_3, %c0_4] : memref<8x128xbf16, #tpu.memory_space<vmem>>, vector<8x128xbf16>
    tpu.vector_store %arg4[%c0_3, %c0_4], %3 {strides = array<i32>} : memref<8x128xbf16, #tpu.memory_space<vmem>>, vector<8x128xbf16>,
    %c0_i32 = arith.constant 0 : i32
    %5 = arith.cmpi eq, %arg1, %c0_i32 : i32
    %6 = arith.extui %5 : i1 to i32
    %c0_i32_5 = arith.constant 0 : i32
    %7 = arith.cmpi ne, %6, %c0_i32_5 : i32
    scf.if %7 {
      %cst_20 = arith.constant 0.000000e+00 : f32
      %21 = vector.broadcast %cst_20 : f32 to vector<1x8x1xf32>
      %c0_21 = arith.constant 0 : index
      %c0_22 = arith.constant 0 : index
      %c0_23 = arith.constant 0 : index
      %22 = vector.load %arg5[%c0_21, %c0_22, %c0_23] : memref<1x8x1xf32, #tpu.memory_space<vmem>>, vector<1x8x1xf32>
      tpu.vector_store %arg5[%c0_21, %c0_22, %c0_23], %21 {strides = array<i32>} : memref<1x8x1xf32, #tpu.memory_space<vmem>>, vector<1x8x1xf32>,
      %cst_24 = arith.constant 0.000000e+00 : f32
      %23 = vector.broadcast %cst_24 : f32 to vector<1x8x1xf32>
      %c0_25 = arith.constant 0 : index
      %c0_26 = arith.constant 0 : index
      %c0_27 = arith.constant 0 : index
      %24 = vector.load %arg6[%c0_25, %c0_26, %c0_27] : memref<1x8x1xf32, #tpu.memory_space<vmem>>, vector<1x8x1xf32>
      tpu.vector_store %arg6[%c0_25, %c0_26, %c0_27], %23 {strides = array<i32>} : memref<1x8x1xf32, #tpu.memory_space<vmem>>, vector<1x8x1xf32>,
    } else {
    }
    %c0_6 = arith.constant 0 : index
    %c0_7 = arith.constant 0 : index
    %c0_8 = arith.constant 0 : index
    %8 = vector.load %arg5[%c0_6, %c0_7, %c0_8] : memref<1x8x1xf32, #tpu.memory_space<vmem>>, vector<1x8x1xf32>
    %cst_9 = arith.constant dense<0.000000e+00> : vector<8xf32>
    %9 = vector.multi_reduction <add>, %2, %cst_9 [1] : vector<8x128xf32> to vector<8xf32>
    %10 = vector.shape_cast %9 : vector<8xf32> to vector<8x1xf32>
    %11 = vector.shape_cast %10 : vector<8x1xf32> to vector<1x8x1xf32>
    %12 = arith.addf %8, %11 : vector<1x8x1xf32>
    %c0_10 = arith.constant 0 : index
    %c0_11 = arith.constant 0 : index
    %c0_12 = arith.constant 0 : index
    %13 = vector.load %arg5[%c0_10, %c0_11, %c0_12] : memref<1x8x1xf32, #tpu.memory_space<vmem>>, vector<1x8x1xf32>
    tpu.vector_store %arg5[%c0_10, %c0_11, %c0_12], %12 {strides = array<i32>} : memref<1x8x1xf32, #tpu.memory_space<vmem>>, vector<1x8x1xf32>,
    %c0_13 = arith.constant 0 : index
    %c0_14 = arith.constant 0 : index
    %c0_15 = arith.constant 0 : index
    %14 = vector.load %arg6[%c0_13, %c0_14, %c0_15] : memref<1x8x1xf32, #tpu.memory_space<vmem>>, vector<1x8x1xf32>
    %15 = arith.mulf %2, %2 : vector<8x128xf32>
    %cst_16 = arith.constant dense<0.000000e+00> : vector<8xf32>
    %16 = vector.multi_reduction <add>, %15, %cst_16 [1] : vector<8x128xf32> to vector<8xf32>
    %17 = vector.shape_cast %16 : vector<8xf32> to vector<8x1xf32>
    %18 = vector.shape_cast %17 : vector<8x1xf32> to vector<1x8x1xf32>
    %19 = arith.addf %14, %18 : vector<1x8x1xf32>
    %c0_17 = arith.constant 0 : index
    %c0_18 = arith.constant 0 : index
    %c0_19 = arith.constant 0 : index
    %20 = vector.load %arg6[%c0_17, %c0_18, %c0_19] : memref<1x8x1xf32, #tpu.memory_space<vmem>>, vector<1x8x1xf32>
    tpu.vector_store %arg6[%c0_17, %c0_18, %c0_19], %19 {strides = array<i32>} : memref<1x8x1xf32, #tpu.memory_space<vmem>>, vector<1x8x1xf32>,
    return
  }
  func.func @transform_0(%arg0: i32, %arg1: i32) -> (i32, i32) {
    %c1_i32 = arith.constant 1 : i32
    %0 = arith.muli %arg0, %c1_i32 : i32
    %1 = arith.addi %0, %arg1 : i32
    %c0_i32 = arith.constant 0 : i32
    %c0_i32_0 = arith.constant 0 : i32
    return %c0_i32, %1 : i32, i32
  }
  func.func @transform_1(%arg0: i32, %arg1: i32) -> (i32, i32) {
    %c0_i32 = arith.constant 0 : i32
    %c0_i32_0 = arith.constant 0 : i32
    %c0_i32_1 = arith.constant 0 : i32
    return %c0_i32, %c0_i32_0 : i32, i32
  }
  func.func @transform_2(%arg0: i32, %arg1: i32) -> (i32, i32) {
    %c1_i32 = arith.constant 1 : i32
    %0 = arith.muli %arg0, %c1_i32 : i32
    %1 = arith.addi %0, %arg1 : i32
    %c0_i32 = arith.constant 0 : i32
    %c0_i32_0 = arith.constant 0 : i32
    return %c0_i32, %1 : i32, i32
  }
  func.func @transform_3(%arg0: i32, %arg1: i32) -> (i32, i32, i32) {
    %c0_i32 = arith.constant 0 : i32
    %c0_i32_0 = arith.constant 0 : i32
    %c0_i32_1 = arith.constant 0 : i32
    return %arg0, %c0_i32, %c0_i32_0 : i32, i32, i32
  }
  func.func @transform_4(%arg0: i32, %arg1: i32) -> (i32, i32, i32) {
    %c0_i32 = arith.constant 0 : i32
    %c0_i32_0 = arith.constant 0 : i32
    %c0_i32_1 = arith.constant 0 : i32
    return %arg0, %c0_i32, %c0_i32_0 : i32, i32, i32
  }
}

module attributes {stable_mosaic.version = 11 : i64} {
  func.func @bn_relu_kernel(%arg0: i32, %arg1: memref<8x128xbf16, #tpu.memory_space<vmem>>, %arg2: memref<8x1xf32, #tpu.memory_space<vmem>>, %arg3: memref<8x1xf32, #tpu.memory_space<vmem>>, %arg4: memref<8x128xf32, #tpu.memory_space<vmem>>) attributes {dimension_semantics = [#tpu.dimension_semantics<parallel>], iteration_bounds = array<i64: 1>, scalar_prefetch = 0 : i64, scratch_operands = 0 : i64, tpu.core_type = #tpu.core_type<tc>, window_params = [{transform_indices = @transform_0, window_bounds = array<i64: 8, 128>}, {pipeline_mode = #tpu.pipeline_mode<synchronous>, transform_indices = @transform_1, window_bounds = array<i64: 8, 1>}, {pipeline_mode = #tpu.pipeline_mode<synchronous>, transform_indices = @transform_2, window_bounds = array<i64: 8, 1>}, {transform_indices = @transform_3, window_bounds = array<i64: 8, 128>}]} {
    %c0 = arith.constant 0 : index
    %c0_0 = arith.constant 0 : index
    %0 = vector.load %arg1[%c0, %c0_0] : memref<8x128xbf16, #tpu.memory_space<vmem>>, vector<8x128xbf16>
    %1 = arith.extf %0 : vector<8x128xbf16> to vector<8x128xf32>
    %c0_1 = arith.constant 0 : index
    %c0_2 = arith.constant 0 : index
    %2 = vector.load %arg2[%c0_1, %c0_2] : memref<8x1xf32, #tpu.memory_space<vmem>>, vector<8x1xf32>
    %3 = vector.broadcast %2 : vector<8x1xf32> to vector<8x128xf32>
    %4 = arith.mulf %1, %3 : vector<8x128xf32>
    %c0_3 = arith.constant 0 : index
    %c0_4 = arith.constant 0 : index
    %5 = vector.load %arg3[%c0_3, %c0_4] : memref<8x1xf32, #tpu.memory_space<vmem>>, vector<8x1xf32>
    %6 = vector.broadcast %5 : vector<8x1xf32> to vector<8x128xf32>
    %7 = arith.addf %4, %6 : vector<8x128xf32>
    %cst = arith.constant 0.000000e+00 : f32
    %8 = vector.broadcast %cst : f32 to vector<8x128xf32>
    %9 = arith.maximumf %7, %8 : vector<8x128xf32>
    %c0_5 = arith.constant 0 : index
    %c0_6 = arith.constant 0 : index
    %10 = vector.load %arg4[%c0_5, %c0_6] : memref<8x128xf32, #tpu.memory_space<vmem>>, vector<8x128xf32>
    tpu.vector_store %arg4[%c0_5, %c0_6], %9 {strides = array<i32>} : memref<8x128xf32, #tpu.memory_space<vmem>>, vector<8x128xf32>,
    return
  }
  func.func @transform_0(%arg0: i32) -> (i32, i32) {
    %c0_i32 = arith.constant 0 : i32
    %c0_i32_0 = arith.constant 0 : i32
    return %c0_i32, %arg0 : i32, i32
  }
  func.func @transform_1(%arg0: i32) -> (i32, i32) {
    %c0_i32 = arith.constant 0 : i32
    %c0_i32_0 = arith.constant 0 : i32
    %c0_i32_1 = arith.constant 0 : i32
    return %c0_i32, %c0_i32_0 : i32, i32
  }
  func.func @transform_2(%arg0: i32) -> (i32, i32) {
    %c0_i32 = arith.constant 0 : i32
    %c0_i32_0 = arith.constant 0 : i32
    %c0_i32_1 = arith.constant 0 : i32
    return %c0_i32, %c0_i32_0 : i32, i32
  }
  func.func @transform_3(%arg0: i32) -> (i32, i32) {
    %c0_i32 = arith.constant 0 : i32
    %c0_i32_0 = arith.constant 0 : i32
    return %c0_i32, %arg0 : i32, i32
  }
}

</mosaic_0001>

<bundles_post_ra>
// kernel: conv3x3_forward.3
= control target key start
LH: loop header
LB: loop body
LE: loop exit
PB: predicated region body
PF: predicated region fallthrough
CT: control target
= control target key end

     0   :  { %v38_v0 = vmov 0   ;;  %s71_s1 = inlined_call_operand.vmem [shape: f32[8,1], index: 1, kind: input, shape index: {}]   ;;  %s72_s2 = inlined_call_operand.vmem [shape: f32[8,1], index: 2, kind: input, shape index: {}]   ;;  %s73_s0 = inlined_call_operand.vmem [shape: bf16[8,128], index: 0, kind: input, shape index: {}]   ;;  %s74_s3 = inlined_call_operand.vmem [shape: f32[8,128], index: 3, kind: output, shape index: {}]  }
   0x1   :  { %37 = vset.pattern.permute.xlu0 %v38_v0  ;;  %v16_v1 = vld [vmem:[%s71_s1] sm:$0xff] }
   0x2   :  { %19 = vperm.xlu0 %37, %v16_v1   ;;  %v23_v2 = vld [vmem:[%s72_s2] sm:$0xff] }
   0x3   :  { %v14_v3 = vld [vmem:[%s73_s0] sm:$0xf] }
   0x4   :  { %v15_v4 = vunpack.c.l.bf16 %v14_v3 }
   0x6   :  { %26 = vperm.xlu0 %37, %v23_v2  }
  0x7d   :  { %v20_v5 = vpop.permute.xlu0 %19 }
  0x7e   :  { %v22_v6 = vmul.f32 %v20_v5, %v15_v4 }
  0x81   :  { %v27_v7 = vpop.permute.xlu0 %26 }
  0x82   :  { %v29_v8 = vadd.f32 %v27_v7, %v22_v6 }
  0x84   :  { %v30_v9 = vmax.f32 %v29_v8, 0.0 }
  0x86   :  { %31 = vst [vmem:[%s74_s3] sm:$0xff] %v30_v9 }

// kernel: conv3x3_forward.2
= control target key start
LH: loop header
LB: loop body
LE: loop exit
PB: predicated region body
PF: predicated region fallthrough
CT: control target
= control target key end

     0   :  { %vm68_vm0 = vcmask 1041408   ;;  %v193_v0 = vmov 0.0   ;;  %vm194_vm1 = vmmov 0   ;;  %vm64_vm2 = vcmask 293888   ;;  %s257_s0 = inlined_call_operand.vmem [shape: bf16[36,128], index: 0, kind: input, shape index: {}]   ;;  %s258_s1 = inlined_call_operand.vmem [shape: bf16[8,36], index: 1, kind: input, shape index: {}]   ;;  %s259_s3 = inlined_call_operand.vmem [shape: f32[1,8,1], index: 3, kind: output, shape index: {1}]   ;;  %s260_s2 = inlined_call_operand.vmem [shape: bf16[8,128], index: 2, kind: output, shape index: {0}]   ;;  %s261_s4 = inlined_call_operand.vmem [shape: f32[1,8,1], index: 4, kind: output, shape index: {2}]  }
   0x1   :  { %178 = vmatprep.subr.bf16.mxu0 %v193_v0  ;;  %v190_v1 = vld [vmem:[%s257_s0 + $0x10] ss:$0 sps:$4 sm:$0x33]   ;;  %184 = vmatprep.mubr.msk.bf16.mxu0 %vm194_vm1, %v193_v0  ;;  %v191_v3 = vld [vmem:[%s257_s0 + $0x8] sm:$0xff]   ;;  %v192_v4 = vld [vmem:[%s257_s0] sm:$0xff]   ;;  %vm118_vm3 = vcmask 7168  }
   0x2   :  { %v70_v2 = vsel %vm68_vm0, %v190_v1, 0  ;;  %v43_v5 = vld [vmem:[%s258_s1] sm:$0xf]  ;;  %119 = vst.msk [vmem:[%s259_s3] sm:$0xff] %vm118_vm3, %v193_v0  ;;  %120 = vst.msk [vmem:[%s261_s4] sm:$0xff] %vm118_vm3, %v193_v0 }
   0x3   :  { %179 = vmatpush3.bf16.msra.mxu0 %v70_v2 }
   0x4   :  { %180 = vmatprep.subr.bf16.mxu0 %v193_v0 }
   0x7   :  { %181 = vmatpush3.bf16.msra.mxu0 %v191_v3 }
   0x8   :  { %182 = vmatprep.subr.bf16.mxu0 %v193_v0 }
   0x9   :  { %v121_v12 = vld [vmem:[%s259_s3] sm:$0xff] }
   0xa   :  { %v127_v15 = vld [vmem:[%s261_s4] sm:$0xff] }
   0xb   :  { %183 = vmatpush3.bf16.msra.mxu0 %v192_v4 }
   0xe   :  { %185 = vmatmul.mubr.msk.bf16.vlgmr.msra.gmra.mxu0 %vm64_vm2, %v43_v5 }
  0xce   :  { %v106_v6 = vpop.f32.mrf.mxu0 }
  0xcf   :  { %v112_v7 = vpack.c.bf16 %v106_v6, %v106_v6  ;;  %122 = vadd.xlane.f32.xlu0 %v106_v6  ;;  %v128_v9 = vmul.f32 %v106_v6, %v106_v6 }
  0xd0   :  { %v186_v8 = vpop.f32.mrf.mxu0 }
  0xd1   :  { %113 = vst [vmem:[%s260_s2] sm:$0xf] %v112_v7 }
  0xd2   :  { %v109_v10 = vpop.f32.mrf.mxu0 }
  0xd3   :  { %129 = vadd.xlane.f32.xlu0 %v128_v9 }
  0xd4   :  { %v187_v11 = vpop.f32.mrf.mxu0 }
 0x158   :  { %v123_v13 = vpop.xlane.xlu0 %122 }
 0x159   :  { %v124_v14 = vadd.f32 %v123_v13, %v121_v12 }
 0x15b   :  { %126 = vst.msk [vmem:[%s259_s3] sm:$0xff] %vm118_vm3, %v124_v14 }
 0x15c   :  { %v130_v16 = vpop.xlane.xlu0 %129 }
 0x15d   :  { %v131_v17 = vadd.f32 %v130_v16, %v127_v15 }
 0x15f   :  { %132 = vst.msk [vmem:[%s261_s4] sm:$0xff] %vm118_vm3, %v131_v17 }

</bundles_post_ra>
